<compile_context>
chip_gen: v5e
topology: v5e:2x2
jax: 0.10.0
libtpu: 0.0.40
codegen_flags: <defaults>
</compile_context>

<pallas_src>
import math
from functools import partial

import jax
import jax.numpy as jnp
from jax.experimental import pallas as pl
from jax.experimental.pallas import tpu as pltpu


def _round_up(x, m):
    return ((x + m - 1) // m) * m


# ---------------------------------------------------------------------------
# Pallas kernel: fc1 -> relu -> fc2 -> relu -> fused [mu | sigma] head
# ---------------------------------------------------------------------------
def actor_forward_kernel(state_ref, w1_ref, w2_ref, wh_ref, bias_ref, out_ref,
                         *, action_dims):
    reparam_noise = 1e-6

    fc1_pad = w1_ref.shape[1]
    fc2_pad = w2_ref.shape[1]
    head_pad = wh_ref.shape[1]

    x = state_ref[...]                                   # (TILE_B, STATE_PAD)

    # Packed bias rows: row 0 -> b1, row 1 -> b2, row 2 -> [bmu | bsig].
    b1 = bias_ref[0:1, :fc1_pad]
    b2 = bias_ref[1:2, :fc2_pad]
    bh = bias_ref[2:3, :head_pad]

    h1 = jnp.dot(x, w1_ref[...], preferred_element_type=jnp.float32) + b1
    h1 = jnp.maximum(h1, 0.0)                            # F.relu

    h2 = jnp.dot(h1, w2_ref[...], preferred_element_type=jnp.float32) + b2
    h2 = jnp.maximum(h2, 0.0)                            # F.relu

    # Fused head: columns [0, act) = mu, [act, 2*act) = sigma, rest = padding.
    head = jnp.dot(h2, wh_ref[...], preferred_element_type=jnp.float32) + bh

    col = jax.lax.broadcasted_iota(jnp.int32, head.shape, 1)
    is_sigma = jnp.logical_and(col >= action_dims, col < 2 * action_dims)
    out_ref[...] = jnp.where(is_sigma,
                             jnp.clip(head, reparam_noise, 1.0),  # T.clamp
                             head)


# ---------------------------------------------------------------------------
# Wrapper: batch padding/tiling + lane-dense output slicing (jit-compiled)
# ---------------------------------------------------------------------------
@partial(jax.jit, static_argnames=("state_dims", "action_dims", "tile_b"))
def actor_forward(state, packed, *, state_dims, action_dims, tile_b=256):
    """state: (B, state_dims) f32; packed: dict from pack_params. -> (mu, sigma)."""
    B = state.shape[0]
    w1, w2, wh, bias = packed["w1"], packed["w2"], packed["wh"], packed["bias"]
    state_pad = w1.shape[0]
    fc1_pad = w1.shape[1]
    fc2_pad = w2.shape[1]
    head_pad = wh.shape[1]

    # Batch: pad to a multiple of 8 (sublane); tile over a grid for large B.
    b_pad = _round_up(B, 8)
    if b_pad <= tile_b:
        tb = b_pad
    else:
        tb = tile_b
        b_pad = _round_up(B, tb)
    grid_b = b_pad // tb

    xs = jnp.zeros((b_pad, state_pad), jnp.float32)
    xs = xs.at[:B, :state_dims].set(state.astype(jnp.float32))

    out = pl.pallas_call(
        partial(actor_forward_kernel, action_dims=action_dims),
        out_shape=jax.ShapeDtypeStruct((b_pad, head_pad), jnp.float32),
        grid=(grid_b,),
        in_specs=[
            pl.BlockSpec((tb, state_pad), lambda i: (i, 0)),        # state tile
            pl.BlockSpec((state_pad, fc1_pad), lambda i: (0, 0)),   # w1 resident
            pl.BlockSpec((fc1_pad, fc2_pad), lambda i: (0, 0)),     # w2 resident
            pl.BlockSpec((fc2_pad, head_pad), lambda i: (0, 0)),    # w_head resident
            pl.BlockSpec(bias.shape, lambda i: (0, 0)),             # packed biases
        ],
        out_specs=pl.BlockSpec((tb, head_pad), lambda i: (i, 0)),
        compiler_params=pltpu.CompilerParams(
            dimension_semantics=("parallel",)),  # shards over v7x's 2 TCs
    )(xs, w1, w2, wh, bias)

    mu = out[:B, :action_dims]
    sigma = out[:B, action_dims:2 * action_dims]
    return mu, sigma


# ---------------------------------------------------------------------------
# Parameter init (mimics PyTorch nn.Linear default U(-1/sqrt(fan_in), ...)).
# Raw weights are stored transposed as (in_dim, out_dim).
# ---------------------------------------------------------------------------
def init_linear(key, in_dim, out_dim):
    kw, kb = jax.random.split(key)
    bound = 1.0 / math.sqrt(in_dim)
    w = jax.random.uniform(kw, (in_dim, out_dim), jnp.float32, -bound, bound)
    b = jax.random.uniform(kb, (1, out_dim), jnp.float32, -bound, bound)
    return w, b


def make_params(key, state_dims, fc1_dims, fc2_dims, action_dims):
    k1, k2, k3, k4 = jax.random.split(key, 4)
    w1, b1 = init_linear(k1, state_dims, fc1_dims)
    w2, b2 = init_linear(k2, fc1_dims, fc2_dims)
    wmu, bmu = init_linear(k3, fc2_dims, action_dims)
    wsig, bsig = init_linear(k4, fc2_dims, action_dims)
    return dict(w1=w1, b1=b1, w2=w2, b2=b2,
                wmu=wmu, bmu=bmu, wsig=wsig, bsig=bsig)


# ---------------------------------------------------------------------------
# One-time packing: pad to (8,128)-aligned shapes, fuse mu/sigma head,
# pack biases into a single (3, max_pad) buffer.
# ---------------------------------------------------------------------------
def pack_params(p, state_dims, fc1_dims, fc2_dims, action_dims):
    state_pad = _round_up(state_dims, 128)
    fc1_pad = _round_up(fc1_dims, 128)
    fc2_pad = _round_up(fc2_dims, 128)
    head_pad = _round_up(2 * action_dims, 128)
    max_pad = max(fc1_pad, fc2_pad, head_pad)

    w1 = jnp.zeros((state_pad, fc1_pad), jnp.float32)
    w1 = w1.at[:state_dims, :fc1_dims].set(p["w1"])

    w2 = jnp.zeros((fc1_pad, fc2_pad), jnp.float32)
    w2 = w2.at[:fc1_dims, :fc2_dims].set(p["w2"])

    wh = jnp.zeros((fc2_pad, head_pad), jnp.float32)
    wh = wh.at[:fc2_dims, :action_dims].set(p["wmu"])
    wh = wh.at[:fc2_dims, action_dims:2 * action_dims].set(p["wsig"])

    bias = jnp.zeros((3, max_pad), jnp.float32)
    bias = bias.at[0, :fc1_dims].set(p["b1"][0])
    bias = bias.at[1, :fc2_dims].set(p["b2"][0])
    bias = bias.at[2, :action_dims].set(p["bmu"][0])
    bias = bias.at[2, action_dims:2 * action_dims].set(p["bsig"][0])

    return dict(w1=w1, w2=w2, wh=wh, bias=bias)


# ---------------------------------------------------------------------------
# Pure-JAX reference for sanity check (on the raw, unpadded params)
# ---------------------------------------------------------------------------
def actor_forward_ref(state, p):
    h1 = jnp.maximum(state @ p["w1"] + p["b1"], 0.0)
    h2 = jnp.maximum(h1 @ p["w2"] + p["b2"], 0.0)
    mu = h2 @ p["wmu"] + p["bmu"]
    sigma = jnp.clip(h2 @ p["wsig"] + p["bsig"], 1e-6, 1.0)
    return mu, sigma


if __name__ == "__main__":
    state_dims, fc1_dims, fc2_dims, action_dims = 32, 64, 64, 8

    key = jax.random.PRNGKey(0)
    kparams, kstate_a, kstate_b = jax.random.split(key, 3)

    raw = make_params(kparams, state_dims, fc1_dims, fc2_dims, action_dims)
    packed = pack_params(raw, state_dims, fc1_dims, fc2_dims, action_dims)

    # Small batch (single grid step).
    state_small = jax.random.normal(kstate_a, (8, state_dims), jnp.float32)
    mu, sigma = actor_forward(state_small, packed,
                              state_dims=state_dims, action_dims=action_dims)
    jax.block_until_ready((mu, sigma))
    mu_r, sigma_r = actor_forward_ref(state_small, raw)
    assert jnp.allclose(mu, mu_r, atol=1e-5, rtol=1e-5)
    assert jnp.allclose(sigma, sigma_r, atol=1e-5, rtol=1e-5)
    assert jnp.all(sigma >= 1e-6) and jnp.all(sigma <= 1.0)

    # Larger, non-multiple batch (exercises batch tiling + padding path).
    state_big = jax.random.normal(kstate_b, (300, state_dims), jnp.float32)
    mu2, sigma2 = actor_forward(state_big, packed, state_dims=state_dims,
                                action_dims=action_dims, tile_b=128)
    jax.block_until_ready((mu2, sigma2))
    mu2_r, sigma2_r = actor_forward_ref(state_big, raw)
    assert jnp.allclose(mu2, mu2_r, atol=1e-5, rtol=1e-5)
    assert jnp.allclose(sigma2, sigma2_r, atol=1e-5, rtol=1e-5)

    # TODO(synk): sample_normal (rsample + tanh squashing + log_prob) is
    # stochastic sampling outside forward(); not part of this kernel.
    print("KERNEL_OK")
</pallas_src>

<mosaic_0001>
module attributes {stable_mosaic.version = 11 : i64} {
  func.func @actor_forward_kernel(%arg0: i32, %arg1: memref<8x128xf32, #tpu.memory_space<vmem>>, %arg2: memref<128x128xf32, #tpu.memory_space<vmem>>, %arg3: memref<128x128xf32, #tpu.memory_space<vmem>>, %arg4: memref<128x128xf32, #tpu.memory_space<vmem>>, %arg5: memref<3x128xf32, #tpu.memory_space<vmem>>, %arg6: memref<8x128xf32, #tpu.memory_space<vmem>>) attributes {dimension_semantics = [#tpu.dimension_semantics<parallel>], iteration_bounds = array<i64: 1>, scalar_prefetch = 0 : i64, scratch_operands = 0 : i64, tpu.core_type = #tpu.core_type<tc>, window_params = [{transform_indices = @transform_0, window_bounds = array<i64: 8, 128>}, {pipeline_mode = #tpu.pipeline_mode<synchronous>, transform_indices = @transform_1, window_bounds = array<i64: 128, 128>}, {pipeline_mode = #tpu.pipeline_mode<synchronous>, transform_indices = @transform_2, window_bounds = array<i64: 128, 128>}, {pipeline_mode = #tpu.pipeline_mode<synchronous>, transform_indices = @transform_3, window_bounds = array<i64: 128, 128>}, {pipeline_mode = #tpu.pipeline_mode<synchronous>, transform_indices = @transform_4, window_bounds = array<i64: 3, 128>}, {transform_indices = @transform_5, window_bounds = array<i64: 8, 128>}]} {
    %c0 = arith.constant 0 : index
    %c0_0 = arith.constant 0 : index
    %0 = vector.load %arg1[%c0, %c0_0] : memref<8x128xf32, #tpu.memory_space<vmem>>, vector<8x128xf32>
    %c0_1 = arith.constant 0 : index
    %c0_2 = arith.constant 0 : index
    %1 = vector.load %arg5[%c0_1, %c0_2] : memref<3x128xf32, #tpu.memory_space<vmem>>, vector<1x128xf32>
    %c1 = arith.constant 1 : index
    %c0_3 = arith.constant 0 : index
    %2 = vector.load %arg5[%c1, %c0_3] : memref<3x128xf32, #tpu.memory_space<vmem>>, vector<1x128xf32>
    %c2 = arith.constant 2 : index
    %c0_4 = arith.constant 0 : index
    %3 = vector.load %arg5[%c2, %c0_4] : memref<3x128xf32, #tpu.memory_space<vmem>>, vector<1x128xf32>
    %c0_5 = arith.constant 0 : index
    %c0_6 = arith.constant 0 : index
    %4 = vector.load %arg2[%c0_5, %c0_6] : memref<128x128xf32, #tpu.memory_space<vmem>>, vector<128x128xf32>
    %cst = arith.constant dense<0.000000e+00> : vector<8x128xf32>
    %5 = tpu.matmul %0, %4, %cst {dimension_numbers = #tpu.dot_dimension_numbers<[1], [0], [0], [1], [0, 0, 1, 1], [], []>} : vector<8x128xf32>, vector<128x128xf32>, vector<8x128xf32> -> vector<8x128xf32>
    %6 = vector.broadcast %1 : vector<1x128xf32> to vector<8x128xf32>
    %7 = arith.addf %5, %6 : vector<8x128xf32>
    %cst_7 = arith.constant 0.000000e+00 : f32
    %8 = vector.broadcast %cst_7 : f32 to vector<8x128xf32>
    %9 = arith.maximumf %7, %8 : vector<8x128xf32>
    %c0_8 = arith.constant 0 : index
    %c0_9 = arith.constant 0 : index
    %10 = vector.load %arg3[%c0_8, %c0_9] : memref<128x128xf32, #tpu.memory_space<vmem>>, vector<128x128xf32>
    %cst_10 = arith.constant dense<0.000000e+00> : vector<8x128xf32>
    %11 = tpu.matmul %9, %10, %cst_10 {dimension_numbers = #tpu.dot_dimension_numbers<[1], [0], [0], [1], [0, 0, 1, 1], [], []>} : vector<8x128xf32>, vector<128x128xf32>, vector<8x128xf32> -> vector<8x128xf32>
    %12 = vector.broadcast %2 : vector<1x128xf32> to vector<8x128xf32>
    %13 = arith.addf %11, %12 : vector<8x128xf32>
    %cst_11 = arith.constant 0.000000e+00 : f32
    %14 = vector.broadcast %cst_11 : f32 to vector<8x128xf32>
    %15 = arith.maximumf %13, %14 : vector<8x128xf32>
    %c0_12 = arith.constant 0 : index
    %c0_13 = arith.constant 0 : index
    %16 = vector.load %arg4[%c0_12, %c0_13] : memref<128x128xf32, #tpu.memory_space<vmem>>, vector<128x128xf32>
    %cst_14 = arith.constant dense<0.000000e+00> : vector<8x128xf32>
    %17 = tpu.matmul %15, %16, %cst_14 {dimension_numbers = #tpu.dot_dimension_numbers<[1], [0], [0], [1], [0, 0, 1, 1], [], []>} : vector<8x128xf32>, vector<128x128xf32>, vector<8x128xf32> -> vector<8x128xf32>
    %18 = vector.broadcast %3 : vector<1x128xf32> to vector<8x128xf32>
    %19 = arith.addf %17, %18 : vector<8x128xf32>
    %20 = tpu.iota {dimensions = array<i32: 1>} : vector<8x128xi32>
    %c8_i32 = arith.constant 8 : i32
    %21 = vector.broadcast %c8_i32 : i32 to vector<8x128xi32>
    %22 = arith.cmpi sge, %20, %21 : vector<8x128xi32>
    %c16_i32 = arith.constant 16 : i32
    %23 = vector.broadcast %c16_i32 : i32 to vector<8x128xi32>
    %24 = arith.cmpi slt, %20, %23 : vector<8x128xi32>
    %25 = arith.andi %22, %24 : vector<8x128xi1>
    %cst_15 = arith.constant 9.99999997E-7 : f32
    %cst_16 = arith.constant 1.000000e+00 : f32
    %26 = vector.broadcast %cst_15 : f32 to vector<8x128xf32>
    %27 = arith.maximumf %26, %19 : vector<8x128xf32>
    %28 = vector.broadcast %cst_16 : f32 to vector<8x128xf32>
    %29 = arith.minimumf %28, %27 : vector<8x128xf32>
    %30 = arith.select %25, %29, %19 : vector<8x128xi1>, vector<8x128xf32>
    %c0_17 = arith.constant 0 : index
    %c0_18 = arith.constant 0 : index
    %31 = vector.load %arg6[%c0_17, %c0_18] : memref<8x128xf32, #tpu.memory_space<vmem>>, vector<8x128xf32>
    tpu.vector_store %arg6[%c0_17, %c0_18], %30 {strides = array<i32>} : memref<8x128xf32, #tpu.memory_space<vmem>>, vector<8x128xf32>,
    return
  }
  func.func @transform_0(%arg0: i32) -> (i32, i32) {
    %c0_i32 = arith.constant 0 : i32
    %c0_i32_0 = arith.constant 0 : i32
    return %arg0, %c0_i32 : i32, i32
  }
  func.func @transform_1(%arg0: i32) -> (i32, i32) {
    %c0_i32 = arith.constant 0 : i32
    %c0_i32_0 = arith.constant 0 : i32
    %c0_i32_1 = arith.constant 0 : i32
    return %c0_i32, %c0_i32_0 : i32, i32
  }
  func.func @transform_2(%arg0: i32) -> (i32, i32) {
    %c0_i32 = arith.constant 0 : i32
    %c0_i32_0 = arith.constant 0 : i32
    %c0_i32_1 = arith.constant 0 : i32
    return %c0_i32, %c0_i32_0 : i32, i32
  }
  func.func @transform_3(%arg0: i32) -> (i32, i32) {
    %c0_i32 = arith.constant 0 : i32
    %c0_i32_0 = arith.constant 0 : i32
    %c0_i32_1 = arith.constant 0 : i32
    return %c0_i32, %c0_i32_0 : i32, i32
  }
  func.func @transform_4(%arg0: i32) -> (i32, i32) {
    %c0_i32 = arith.constant 0 : i32
    %c0_i32_0 = arith.constant 0 : i32
    %c0_i32_1 = arith.constant 0 : i32
    return %c0_i32, %c0_i32_0 : i32, i32
  }
  func.func @transform_5(%arg0: i32) -> (i32, i32) {
    %c0_i32 = arith.constant 0 : i32
    %c0_i32_0 = arith.constant 0 : i32
    return %arg0, %c0_i32 : i32, i32
  }
}

</mosaic_0001>

<bundles_post_ra>
// kernel: actor_forward.1
= control target key start
LH: loop header
LB: loop body
LE: loop exit
PB: predicated region body
PF: predicated region fallthrough
CT: control target
= control target key end

     0   :  { %10 = vsyncpa [#allocation3], 0  ;;  %s342_s0 = inlined_call_operand.vmem [shape: f32[8,128], index: 0, kind: input, shape index: {}]   ;;  %s343_s1 = inlined_call_operand.hbm [shape: f32[128,128], index: 1, kind: input, shape index: {}]   ;;  %s344_s2 = inlined_call_operand.hbm [shape: f32[128,128], index: 2, kind: input, shape index: {}]   ;;  %s345_s3 = inlined_call_operand.hbm [shape: f32[128,128], index: 3, kind: input, shape index: {}]   ;;  %s346_s4 = inlined_call_operand.vmem [shape: f32[3,128], index: 4, kind: input, shape index: {}]   ;;  %s347_s5 = inlined_call_operand.vmem [shape: f32[8,128], index: 5, kind: output, shape index: {}]  }
   0x1   :  { %11 = vsyncpa [#allocation5], 0  ;;  %s31_s20 = sshll.u32 %s344_s2, 4  ;;  %s283_s21 = smov [#allocation4]   ;;  %s32_s20 = int_to_ptr.hbm [resolvable:$true] %s31_s20 }
   0x2   :  { %s33_s22 = sshll.u32 %s283_s21, 4  ;;  %s18_s25 = sshll.u32 %s343_s1, 4  ;;  %s34_s22 = int_to_ptr.vmem [resolvable:$true] %s33_s22  ;;  %s19_s25 = int_to_ptr.hbm [resolvable:$true] %s18_s25 }
   0x3   :  { %s284_s26 = smov 128   ;;  %s285_s27 = smov 8  }
   0x4   :  { %39 = dma.hbm_to_vmem [thread:$0]  %s32_s20, 2048, %s34_s22, [#allocation5], %s284_s26, %s284_s26, %s285_s27  }
   0x5   :  { %s286_s28 = smov [#allocation2]   ;;  %s44_s7 = sshll.u32 %s345_s3, 4  ;;  %s45_s7 = int_to_ptr.hbm [resolvable:$true] %s44_s7 }
   0x6   :  { %s20_s29 = sshll.u32 %s286_s28, 4  ;;  %s287_s2 = smov [#allocation6]   ;;  %s21_s29 = int_to_ptr.vmem [resolvable:$true] %s20_s29 }
   0x7   :  { %26 = dma.hbm_to_vmem [thread:$0]  %s19_s25, 2048, %s21_s29, [#allocation3], %s284_s26, %s284_s26, %s285_s27  }
   0x8   :  { %s46_s8 = sshll.u32 %s287_s2, 4  ;;  %s47_s8 = int_to_ptr.vmem [resolvable:$true] %s46_s8 }
   0x9   :  { %52 = dma.hbm_to_vmem [thread:$0]  %s45_s7, 2048, %s47_s8, [#allocation5], %s284_s26, %s284_s26, %s285_s27  }
   0xa   :  { %279 = dma.done.wait [#allocation3], 2048  }
   0xb   :  { %280 = vsyncadd [#allocation3], 4294965248 }
   0xc   :  { %281 = dma.done.wait [#allocation5], 4096  }
   0xd   :  { %282 = vsyncadd [#allocation5], 4294963200  ;;  %v86_v0 = vld [vmem:[#allocation2 + $0x78] sm:$0xff]  ;;  %v85_v1 = vld [vmem:[#allocation2 + $0x70] sm:$0xff]  ;;  %v184_v57 = vlaneseq }
   0xe   :  { %88 = vmatpush.msra.mxu0 %v86_v0  ;;  %v84_v2 = vld [vmem:[#allocation2 + $0x68] sm:$0xff]  ;;  %v83_v3 = vld [vmem:[#allocation2 + $0x60] sm:$0xff]  ;;  %v124_v4 = vld [vmem:[#allocation4 + $0x78] sm:$0xff] }
   0xf   :  { %v82_v5 = vld [vmem:[#allocation2 + $0x58] sm:$0xff]  ;;  %126 = vmatpush.msra.mxu1 %v124_v4  ;;  %v123_v6 = vld [vmem:[#allocation4 + $0x70] sm:$0xff]  ;;  %v122_v7 = vld [vmem:[#allocation4 + $0x68] sm:$0xff]  ;;  %v185_v59 = vand.u32 127, %v184_v57 }
  0x10   :  { %89 = vmatpush.msra.mxu0 %v85_v1  ;;  %v81_v8 = vld [vmem:[#allocation2 + $0x50] sm:$0xff]  ;;  %v121_v9 = vld [vmem:[#allocation4 + $0x60] sm:$0xff]  ;;  %v80_v10 = vld [vmem:[#allocation2 + $0x48] sm:$0xff] }
  0x11   :  { %127 = vmatpush.msra.mxu1 %v123_v6  ;;  %v120_v11 = vld [vmem:[#allocation4 + $0x58] sm:$0xff]  ;;  %v79_v12 = vld [vmem:[#allocation2 + $0x40] sm:$0xff]  ;;  %v119_v13 = vld [vmem:[#allocation4 + $0x50] sm:$0xff]  ;;  %vm186_vm0 = vcmp.ge.s32.totalorder %v185_v59, 8  ;;  %vm187_vm1 = vcmp.lt.s32.totalorder %v185_v59, 16 }
  0x12   :  { %90 = vmatpush.msra.mxu0 %v84_v2  ;;  %v78_v14 = vld [vmem:[#allocation2 + $0x38] sm:$0xff]  ;;  %v118_v15 = vld [vmem:[#allocation4 + $0x48] sm:$0xff]  ;;  %v77_v16 = vld [vmem:[#allocation2 + $0x30] sm:$0xff] }
  0x13   :  { %128 = vmatpush.msra.mxu1 %v122_v7  ;;  %v117_v17 = vld [vmem:[#allocation4 + $0x40] sm:$0xff]  ;;  %v76_v18 = vld [vmem:[#allocation2 + $0x28] sm:$0xff]  ;;  %v116_v19 = vld [vmem:[#allocation4 + $0x38] sm:$0xff] }
  0x14   :  { %91 = vmatpush.msra.mxu0 %v83_v3  ;;  %v75_v20 = vld [vmem:[#allocation2 + $0x20] sm:$0xff]  ;;  %v115_v21 = vld [vmem:[#allocation4 + $0x30] sm:$0xff]  ;;  %v74_v22 = vld [vmem:[#allocation2 + $0x18] sm:$0xff] }
  0x15   :  { %129 = vmatpush.msra.mxu1 %v121_v9  ;;  %v114_v23 = vld [vmem:[#allocation4 + $0x28] sm:$0xff]  ;;  %v73_v24 = vld [vmem:[#allocation2 + $0x10] sm:$0xff]  ;;  %v113_v25 = vld [vmem:[#allocation4 + $0x20] sm:$0xff] }
  0x16   :  { %92 = vmatpush.msra.mxu0 %v82_v5  ;;  %v72_v26 = vld [vmem:[#allocation2 + $0x8] sm:$0xff]  ;;  %v112_v27 = vld [vmem:[#allocation4 + $0x18] sm:$0xff]  ;;  %v71_v28 = vld [vmem:[#allocation2] sm:$0xff] }
  0x17   :  { %130 = vmatpush.msra.mxu1 %v120_v11  ;;  %v67_v29 = vld [vmem:[%s342_s0] sm:$0xff]  ;;  %v111_v30 = vld [vmem:[#allocation4 + $0x10] sm:$0xff]  ;;  %v110_v31 = vld [vmem:[#allocation4 + $0x8] sm:$0xff] }
  0x18   :  { %93 = vmatpush.msra.mxu0 %v81_v8  ;;  %v109_v32 = vld [vmem:[#allocation4] sm:$0xff]  ;;  %v162_v33 = vld [vmem:[#allocation6 + $0x78] sm:$0xff]  ;;  %v161_v34 = vld [vmem:[#allocation6 + $0x70] sm:$0xff] }
  0x19   :  { %131 = vmatpush.msra.mxu1 %v119_v13  ;;  %164 = vmatpush.msra.mxu2 %v162_v33  ;;  %v160_v35 = vld [vmem:[#allocation6 + $0x68] sm:$0xff]  ;;  %v159_v36 = vld [vmem:[#allocation6 + $0x60] sm:$0xff]  ;;  %v158_v37 = vld [vmem:[#allocation6 + $0x58] sm:$0xff] }
  0x1a   :  { %94 = vmatpush.msra.mxu0 %v80_v10  ;;  %v157_v38 = vld [vmem:[#allocation6 + $0x50] sm:$0xff]  ;;  %v156_v39 = vld [vmem:[#allocation6 + $0x48] sm:$0xff]  ;;  %v155_v40 = vld [vmem:[#allocation6 + $0x40] sm:$0xff] }
  0x1b   :  { %132 = vmatpush.msra.mxu1 %v118_v15  ;;  %165 = vmatpush.msra.mxu2 %v161_v34  ;;  %v154_v41 = vld [vmem:[#allocation6 + $0x38] sm:$0xff]  ;;  %v153_v42 = vld [vmem:[#allocation6 + $0x30] sm:$0xff]  ;;  %v152_v43 = vld [vmem:[#allocation6 + $0x28] sm:$0xff] }
  0x1c   :  { %95 = vmatpush.msra.mxu0 %v79_v12  ;;  %v151_v44 = vld [vmem:[#allocation6 + $0x20] sm:$0xff]  ;;  %v150_v45 = vld [vmem:[#allocation6 + $0x18] sm:$0xff]  ;;  %v149_v50 = vld [vmem:[#allocation6 + $0x10] sm:$0xff] }
  0x1d   :  { %133 = vmatpush.msra.mxu1 %v117_v17  ;;  %166 = vmatpush.msra.mxu2 %v160_v35  ;;  %v204_v46 = vld [vmem:[%s346_s4] ss:$0 sm:$0xff]  ;;  %v148_v51 = vld [vmem:[#allocation6 + $0x8] sm:$0xff]  ;;  %v205_v53 = vld [vmem:[%s346_s4 + $0x1] ss:$0 sm:$0xff] }
  0x1e   :  { %96 = vmatpush.msra.mxu0 %v78_v14  ;;  %v147_v52 = vld [vmem:[#allocation6] sm:$0xff]  ;;  %vm188_vm2 = vmand %vm186_vm0, %vm187_vm1 }
  0x1f   :  { %134 = vmatpush.msra.mxu1 %v116_v19  ;;  %167 = vmatpush.msra.mxu2 %v159_v36  ;;  %v206_v58 = vld [vmem:[%s346_s4 + $0x2] ss:$0 sm:$0xff] }
  0x20   :  { %97 = vmatpush.msra.mxu0 %v77_v16 }
  0x21   :  { %135 = vmatpush.msra.mxu1 %v115_v21  ;;  %168 = vmatpush.msra.mxu2 %v158_v37 }
  0x22   :  { %98 = vmatpush.msra.mxu0 %v76_v18 }
  0x23   :  { %136 = vmatpush.msra.mxu1 %v114_v23  ;;  %169 = vmatpush.msra.mxu2 %v157_v38 }
  0x24   :  { %99 = vmatpush.msra.mxu0 %v75_v20 }
  0x25   :  { %137 = vmatpush.msra.mxu1 %v113_v25  ;;  %170 = vmatpush.msra.mxu2 %v156_v39 }
  0x26   :  { %100 = vmatpush.msra.mxu0 %v74_v22 }
  0x27   :  { %138 = vmatpush.msra.mxu1 %v112_v27  ;;  %171 = vmatpush.msra.mxu2 %v155_v40 }
  0x28   :  { %101 = vmatpush.msra.mxu0 %v73_v24 }
  0x29   :  { %139 = vmatpush.msra.mxu1 %v111_v30  ;;  %172 = vmatpush.msra.mxu2 %v154_v41 }
  0x2a   :  { %102 = vmatpush.msra.mxu0 %v72_v26 }
  0x2b   :  { %140 = vmatpush.msra.mxu1 %v110_v31  ;;  %173 = vmatpush.msra.mxu2 %v153_v42 }
  0x2c   :  { %103 = vmatpush.msra.mxu0 %v71_v28 }
  0x2d   :  { %104 = vmatmul.f32.vlgmr.msra.gmra.mxu0 %v67_v29  ;;  %141 = vmatpush.msra.mxu1 %v109_v32 }
  0x2e   :  { %174 = vmatpush.msra.mxu2 %v152_v43 }
  0x30   :  { %175 = vmatpush.msra.mxu2 %v151_v44 }
  0x32   :  { %176 = vmatpush.msra.mxu2 %v150_v45 }
  0x34   :  { %177 = vmatpush.msra.mxu2 %v149_v50 }
  0x36   :  { %178 = vmatpush.msra.mxu2 %v148_v51 }
  0x38   :  { %179 = vmatpush.msra.mxu2 %v147_v52 }
  0xaa   :  { %v105_v47 = vpop.f32.mrf.mxu0 }
  0xab   :  { %v106_v48 = vadd.f32 %v204_v46, %v105_v47 }
  0xad   :  { %v108_v49 = vmax.f32 %v106_v48, 0.0 }
  0xaf   :  { %142 = vmatmul.f32.vlgmr.msra.gmra.mxu1 %v108_v49 }
 0x12c   :  { %v143_v54 = vpop.f32.mrf.mxu1 }
 0x12d   :  { %v144_v55 = vadd.f32 %v205_v53, %v143_v54 }
 0x12f   :  { %v146_v56 = vmax.f32 %v144_v55, 0.0 }
 0x131   :  { %180 = vmatmul.f32.vlgmr.msra.gmra.mxu2 %v146_v56 }
 0x1b4   :  { %v181_v60 = vpop.f32.mrf.mxu2 }
 0x1b5   :  { %v182_v61 = vadd.f32 %v206_v58, %v181_v60 }
 0x1b7   :  { %v189_v62 = vmax.f32 %v182_v61, 1e-06 }
 0x1b9   :  { %v190_v63 = vmin.f32 %v189_v62, 1.0 }
 0x1bb   :  { %v191_v0 = vsel %vm188_vm2, %v190_v63, %v182_v61 }
 0x1bc   :  { %192 = vst [vmem:[%s347_s5] sm:$0xff] %v191_v0 }
 0x1bd   :  { %197 = vsyncpa [#allocation3], 1 }
 0x1be   :  { %198 = vsyncpa [#allocation5], 1 }

</bundles_post_ra>
